<compile_context>
chip_gen: v7x
topology: tpu7x:2x2x1
jax: 0.10.0
libtpu: 0.0.40
codegen_flags: <defaults>
</compile_context>

<pallas_src>
import jax
import jax.numpy as jnp
from jax.experimental import pallas as pl
from jax.experimental.pallas import tpu as pltpu


# ----------------------------------------------------------------------------
# Fused embedding-gather + LSTM-over-time + attention-pooling kernel.
# Gate order matches PyTorch nn.LSTM: [i, f, g, o].
# ----------------------------------------------------------------------------
def siamese_lstm_attn_kernel(ids_ref, emb_ref, wih_ref, whh_ref, b_ref,
                             out_ref):
    """
    ids_ref : (S*B2, 1) i32  time-major token ids (row = t*B2 + b), q ++ doc
    emb_ref : (V, E)    f32  embedding table
    wih_ref : (E, 4H)   f32  input->gate weights (transposed)
    whh_ref : (H, 4H)   f32  hidden->gate weights (transposed)
    b_ref   : (1, 4H)   f32  fused bias (b_ih + b_hh)
    out_ref : (B2, H)   f32  attention-pooled hidden state per row
    """
    SB2 = ids_ref.shape[0]
    V, _E = emb_ref.shape
    H = whh_ref.shape[0]
    B2 = out_ref.shape[0]
    S = SB2 // B2

    # Project the (tiny) vocabulary once: emb @ W_ih -> (V, 4H).
    emb_proj = jnp.dot(emb_ref[...], wih_ref[...],
                       preferred_element_type=jnp.float32)

    # Fused embedding gather as a one-hot MXU matmul (fully vectorized):
    #   onehot (S*B2, V) @ emb_proj (V, 4H) == emb[ids] @ W_ih, time-major.
    vocab_iota = jax.lax.broadcasted_iota(jnp.int32, (SB2, V), 1)
    onehot = (vocab_iota == ids_ref[...]).astype(jnp.float32)
    xw = jnp.dot(onehot, emb_proj,
                 preferred_element_type=jnp.float32) + b_ref[...]  # (S*B2,4H)

    whh = whh_ref[...]                                             # (H, 4H)

    # Lane mask selecting the g-gate lanes [2H, 3H) -- hoisted out of the loop.
    lane = jax.lax.broadcasted_iota(jnp.int32, (B2, 4 * H), 1)
    g_mask = (lane >= 2 * H) & (lane < 3 * H)

    h = jnp.zeros((B2, H), jnp.float32)
    c = jnp.zeros((B2, H), jnp.float32)
    h_ts = []

    # Fully unrolled recurrence; only h @ W_hh remains per step.
    for t in range(S):
        gates = xw[t * B2:(t + 1) * B2, :] + jnp.dot(
            h, whh, preferred_element_type=jnp.float32)            # (B2, 4H)
        # Two full-vreg activations + lane-masked select (i,f,o sigmoid,
        # g tanh), then slice once for the elementwise recombination.
        act = jnp.where(g_mask, jnp.tanh(gates), jax.nn.sigmoid(gates))
        i_g = act[:, 0 * H:1 * H]
        f_g = act[:, 1 * H:2 * H]
        g_g = act[:, 2 * H:3 * H]
        o_g = act[:, 3 * H:4 * H]
        c = f_g * c + i_g * g_g
        h = o_g * jnp.tanh(c)
        h_ts.append(h)                         # stays vreg-resident

    # Attention-pooling epilogue on vreg-resident h_t (no VMEM round trip):
    # softmax over time of <h_t, h_T>, then weighted sum of h_t.
    h_T = h
    logits = jnp.concatenate(
        [jnp.sum(ht * h_T, axis=-1, keepdims=True) for ht in h_ts],
        axis=1)                                                    # (B2, S)
    logits = logits - jnp.max(logits, axis=1, keepdims=True)
    e = jnp.exp(logits)
    soft = e / jnp.sum(e, axis=1, keepdims=True)                   # (B2, S)

    pooled = soft[:, 0:1] * h_ts[0]
    for t in range(1, S):
        pooled = pooled + soft[:, t:t + 1] * h_ts[t]
    out_ref[...] = pooled                                          # (B2, H)


def siamese_branch_pallas(ids_tm, emb, w_ih_t, w_hh_t, bias, b2):
    """ids_tm: (S*2B, 1) int32 time-major ids.  Returns pooled (2B, H) f32."""
    H = w_hh_t.shape[0]
    vmem = pltpu.MemorySpace.VMEM
    return pl.pallas_call(
        siamese_lstm_attn_kernel,
        out_shape=jax.ShapeDtypeStruct((b2, H), jnp.float32),
        in_specs=[
            pl.BlockSpec(memory_space=vmem),   # ids_tm  (S*2B, 1) i32
            pl.BlockSpec(memory_space=vmem),   # emb     (V, E)
            pl.BlockSpec(memory_space=vmem),   # w_ih_t  (E, 4H)
            pl.BlockSpec(memory_space=vmem),   # w_hh_t  (H, 4H)
            pl.BlockSpec(memory_space=vmem),   # bias    (1, 4H)
        ],
        out_specs=pl.BlockSpec(memory_space=vmem),
    )(ids_tm, emb, w_ih_t, w_hh_t, bias)


# ----------------------------------------------------------------------------
# SiameseNet forward: one fused kernel call for both branches (shared LSTM).
# ----------------------------------------------------------------------------
def siamese_forward(params, query_ids, doc_ids):
    B, S = query_ids.shape
    ids = jnp.concatenate([query_ids, doc_ids], axis=0)        # (2B, S)
    # Time-major flatten: row index = t * (2B) + b.
    ids_tm = jnp.transpose(ids).reshape(2 * B * S, 1).astype(jnp.int32)
    pooled = siamese_branch_pallas(
        ids_tm, params["embedding"], params["w_ih_t"], params["w_hh_t"],
        params["bias"], 2 * B)
    return pooled[:B], pooled[B:]


# ----------------------------------------------------------------------------
# Pure-JAX reference (for correctness check).
# ----------------------------------------------------------------------------
def lstm_ref(x_tme, w_ih_t, w_hh_t, bias):
    S, B, _E = x_tme.shape
    H = w_hh_t.shape[0]

    def step(carry, x_t):
        h, c = carry
        gates = x_t @ w_ih_t + h @ w_hh_t + bias[0]
        i = jax.nn.sigmoid(gates[:, 0 * H:1 * H])
        f = jax.nn.sigmoid(gates[:, 1 * H:2 * H])
        g = jnp.tanh(gates[:, 2 * H:3 * H])
        o = jax.nn.sigmoid(gates[:, 3 * H:4 * H])
        c = f * c + i * g
        h = o * jnp.tanh(c)
        return (h, c), h

    (h_T, _), outs = jax.lax.scan(
        step, (jnp.zeros((B, H), jnp.float32), jnp.zeros((B, H), jnp.float32)),
        x_tme)
    return outs, h_T


def siamese_ref(params, query_ids, doc_ids):
    emb = params["embedding"]

    def branch(ids):
        x = jnp.transpose(emb[ids], (1, 0, 2)).astype(jnp.float32)
        out_sbh, h_T = lstm_ref(x, params["w_ih_t"], params["w_hh_t"],
                                params["bias"])
        out_bsh = jnp.transpose(out_sbh, (1, 0, 2))
        attn = jnp.einsum("bsh,bh->bs", out_bsh, h_T)
        soft = jax.nn.softmax(attn, axis=1)
        return jnp.einsum("bsh,bs->bh", out_bsh, soft)

    return branch(query_ids), branch(doc_ids)


# ----------------------------------------------------------------------------
# Deterministic parameter init (PyTorch-like uniform(-1/sqrt(H), 1/sqrt(H))).
# ----------------------------------------------------------------------------
def init_params(key, vocab_size, embedding_length, hidden_size):
    k_emb, k1, k2, k3, k4 = jax.random.split(key, 5)
    bound = 1.0 / jnp.sqrt(hidden_size)
    emb = jax.random.normal(k_emb, (vocab_size, embedding_length), jnp.float32)
    w_ih = jax.random.uniform(k1, (4 * hidden_size, embedding_length),
                              jnp.float32, -bound, bound)
    w_hh = jax.random.uniform(k2, (4 * hidden_size, hidden_size),
                              jnp.float32, -bound, bound)
    b_ih = jax.random.uniform(k3, (4 * hidden_size,), jnp.float32, -bound, bound)
    b_hh = jax.random.uniform(k4, (4 * hidden_size,), jnp.float32, -bound, bound)
    return {
        "embedding": emb,
        "w_ih_t": jnp.transpose(w_ih),            # (E, 4H)
        "w_hh_t": jnp.transpose(w_hh),            # (H, 4H)
        "bias": (b_ih + b_hh)[None, :],           # (1, 4H)
    }


if __name__ == "__main__":
    batch_size = 2
    seq_len = 8
    vocab_size = 50
    embedding_length = 16
    hidden_size = 32

    key = jax.random.PRNGKey(0)
    k_params, k_q, k_d = jax.random.split(key, 3)
    params = init_params(k_params, vocab_size, embedding_length, hidden_size)

    query = jax.random.randint(k_q, (batch_size, seq_len), 0, vocab_size,
                               dtype=jnp.int32)
    doc = jax.random.randint(k_d, (batch_size, seq_len), 0, vocab_size,
                             dtype=jnp.int32)

    embd_q, embd_d = jax.jit(siamese_forward)(params, query, doc)
    jax.block_until_ready((embd_q, embd_d))

    ref_q, ref_d = siamese_ref(params, query, doc)
    assert embd_q.shape == (batch_size, hidden_size)
    assert embd_d.shape == (batch_size, hidden_size)
    assert jnp.allclose(embd_q, ref_q, atol=1e-5, rtol=1e-5)
    assert jnp.allclose(embd_d, ref_d, atol=1e-5, rtol=1e-5)

    print("KERNEL_OK")
</pallas_src>

<mosaic_0001>
module attributes {stable_mosaic.version = 11 : i64} {
  func.func @siamese_lstm_attn_kernel(%arg0: memref<32x1xi32, #tpu.memory_space<vmem>>, %arg1: memref<50x16xf32, #tpu.memory_space<vmem>>, %arg2: memref<16x128xf32, #tpu.memory_space<vmem>>, %arg3: memref<32x128xf32, #tpu.memory_space<vmem>>, %arg4: memref<1x128xf32, #tpu.memory_space<vmem>>, %arg5: memref<4x32xf32, #tpu.memory_space<vmem>>) attributes {dimension_semantics = [], scalar_prefetch = 0 : i64, scratch_operands = 0 : i64, tpu.core_type = #tpu.core_type<tc>} {
    %c0 = arith.constant 0 : index
    %c0_0 = arith.constant 0 : index
    %0 = vector.load %arg1[%c0, %c0_0] : memref<50x16xf32, #tpu.memory_space<vmem>>, vector<50x16xf32>
    %c0_1 = arith.constant 0 : index
    %c0_2 = arith.constant 0 : index
    %1 = vector.load %arg2[%c0_1, %c0_2] : memref<16x128xf32, #tpu.memory_space<vmem>>, vector<16x128xf32>
    %cst = arith.constant dense<0.000000e+00> : vector<50x128xf32>
    %2 = tpu.matmul %0, %1, %cst {dimension_numbers = #tpu.dot_dimension_numbers<[1], [0], [0], [1], [0, 0, 1, 1], [], []>} : vector<50x16xf32>, vector<16x128xf32>, vector<50x128xf32> -> vector<50x128xf32>
    %3 = tpu.iota {dimensions = array<i32: 1>} : vector<32x50xi32>
    %c0_3 = arith.constant 0 : index
    %c0_4 = arith.constant 0 : index
    %4 = vector.load %arg0[%c0_3, %c0_4] : memref<32x1xi32, #tpu.memory_space<vmem>>, vector<32x1xi32>
    %5 = vector.broadcast %4 : vector<32x1xi32> to vector<32x50xi32>
    %6 = arith.cmpi eq, %3, %5 : vector<32x50xi32>
    %7 = arith.extui %6 : vector<32x50xi1> to vector<32x50xi32>
    %8 = arith.sitofp %7 : vector<32x50xi32> to vector<32x50xf32>
    %cst_5 = arith.constant dense<0.000000e+00> : vector<32x128xf32>
    %9 = tpu.matmul %8, %2, %cst_5 {dimension_numbers = #tpu.dot_dimension_numbers<[1], [0], [0], [1], [0, 0, 1, 1], [], []>} : vector<32x50xf32>, vector<50x128xf32>, vector<32x128xf32> -> vector<32x128xf32>
    %c0_6 = arith.constant 0 : index
    %c0_7 = arith.constant 0 : index
    %10 = vector.load %arg4[%c0_6, %c0_7] : memref<1x128xf32, #tpu.memory_space<vmem>>, vector<1x128xf32>
    %11 = vector.broadcast %10 : vector<1x128xf32> to vector<32x128xf32>
    %12 = arith.addf %9, %11 : vector<32x128xf32>
    %c0_8 = arith.constant 0 : index
    %c0_9 = arith.constant 0 : index
    %13 = vector.load %arg3[%c0_8, %c0_9] : memref<32x128xf32, #tpu.memory_space<vmem>>, vector<32x128xf32>
    %14 = tpu.iota {dimensions = array<i32: 1>} : vector<4x128xi32>
    %c64_i32 = arith.constant 64 : i32
    %15 = vector.broadcast %c64_i32 : i32 to vector<4x128xi32>
    %16 = arith.cmpi sge, %14, %15 : vector<4x128xi32>
    %c96_i32 = arith.constant 96 : i32
    %17 = vector.broadcast %c96_i32 : i32 to vector<4x128xi32>
    %18 = arith.cmpi slt, %14, %17 : vector<4x128xi32>
    %19 = arith.andi %16, %18 : vector<4x128xi1>
    %cst_10 = arith.constant 0.000000e+00 : f32
    %20 = vector.broadcast %cst_10 : f32 to vector<4x32xf32>
    %cst_11 = arith.constant 0.000000e+00 : f32
    %21 = vector.broadcast %cst_11 : f32 to vector<4x32xf32>
    %22 = vector.extract_strided_slice %12 {offsets = [0, 0], sizes = [4, 128], strides = [1, 1]} : vector<32x128xf32> to vector<4x128xf32>
    %cst_12 = arith.constant dense<0.000000e+00> : vector<4x128xf32>
    %23 = tpu.matmul %20, %13, %cst_12 {dimension_numbers = #tpu.dot_dimension_numbers<[1], [0], [0], [1], [0, 0, 1, 1], [], []>} : vector<4x32xf32>, vector<32x128xf32>, vector<4x128xf32> -> vector<4x128xf32>
    %24 = arith.addf %22, %23 : vector<4x128xf32>
    %25 = math.tanh %24 : vector<4x128xf32>
    %26 = arith.negf %24 : vector<4x128xf32>
    %27 = math.exp %26 : vector<4x128xf32>
    %cst_13 = arith.constant 1.000000e+00 : f32
    %28 = vector.broadcast %cst_13 : f32 to vector<4x128xf32>
    %29 = arith.addf %28, %27 : vector<4x128xf32>
    %30 = arith.divf %28, %29 : vector<4x128xf32>
    %31 = arith.select %19, %25, %30 : vector<4x128xi1>, vector<4x128xf32>
    %32 = vector.extract_strided_slice %31 {offsets = [0, 0], sizes = [4, 32], strides = [1, 1]} : vector<4x128xf32> to vector<4x32xf32>
    %33 = vector.extract_strided_slice %31 {offsets = [0, 32], sizes = [4, 32], strides = [1, 1]} : vector<4x128xf32> to vector<4x32xf32>
    %34 = vector.extract_strided_slice %31 {offsets = [0, 64], sizes = [4, 32], strides = [1, 1]} : vector<4x128xf32> to vector<4x32xf32>
    %35 = vector.extract_strided_slice %31 {offsets = [0, 96], sizes = [4, 32], strides = [1, 1]} : vector<4x128xf32> to vector<4x32xf32>
    %36 = arith.mulf %33, %21 : vector<4x32xf32>
    %37 = arith.mulf %32, %34 : vector<4x32xf32>
    %38 = arith.addf %36, %37 : vector<4x32xf32>
    %39 = math.tanh %38 : vector<4x32xf32>
    %40 = arith.mulf %35, %39 : vector<4x32xf32>
    %41 = vector.extract_strided_slice %12 {offsets = [4, 0], sizes = [4, 128], strides = [1, 1]} : vector<32x128xf32> to vector<4x128xf32>
    %cst_14 = arith.constant dense<0.000000e+00> : vector<4x128xf32>
    %42 = tpu.matmul %40, %13, %cst_14 {dimension_numbers = #tpu.dot_dimension_numbers<[1], [0], [0], [1], [0, 0, 1, 1], [], []>} : vector<4x32xf32>, vector<32x128xf32>, vector<4x128xf32> -> vector<4x128xf32>
    %43 = arith.addf %41, %42 : vector<4x128xf32>
    %44 = math.tanh %43 : vector<4x128xf32>
    %45 = arith.negf %43 : vector<4x128xf32>
    %46 = math.exp %45 : vector<4x128xf32>
    %cst_15 = arith.constant 1.000000e+00 : f32
    %47 = vector.broadcast %cst_15 : f32 to vector<4x128xf32>
    %48 = arith.addf %47, %46 : vector<4x128xf32>
    %49 = arith.divf %47, %48 : vector<4x128xf32>
    %50 = arith.select %19, %44, %49 : vector<4x128xi1>, vector<4x128xf32>
    %51 = vector.extract_strided_slice %50 {offsets = [0, 0], sizes = [4, 32], strides = [1, 1]} : vector<4x128xf32> to vector<4x32xf32>
    %52 = vector.extract_strided_slice %50 {offsets = [0, 32], sizes = [4, 32], strides = [1, 1]} : vector<4x128xf32> to vector<4x32xf32>
    %53 = vector.extract_strided_slice %50 {offsets = [0, 64], sizes = [4, 32], strides = [1, 1]} : vector<4x128xf32> to vector<4x32xf32>
    %54 = vector.extract_strided_slice %50 {offsets = [0, 96], sizes = [4, 32], strides = [1, 1]} : vector<4x128xf32> to vector<4x32xf32>
    %55 = arith.mulf %52, %38 : vector<4x32xf32>
    %56 = arith.mulf %51, %53 : vector<4x32xf32>
    %57 = arith.addf %55, %56 : vector<4x32xf32>
    %58 = math.tanh %57 : vector<4x32xf32>
    %59 = arith.mulf %54, %58 : vector<4x32xf32>
    %60 = vector.extract_strided_slice %12 {offsets = [8, 0], sizes = [4, 128], strides = [1, 1]} : vector<32x128xf32> to vector<4x128xf32>
    %cst_16 = arith.constant dense<0.000000e+00> : vector<4x128xf32>
    %61 = tpu.matmul %59, %13, %cst_16 {dimension_numbers = #tpu.dot_dimension_numbers<[1], [0], [0], [1], [0, 0, 1, 1], [], []>} : vector<4x32xf32>, vector<32x128xf32>, vector<4x128xf32> -> vector<4x128xf32>
    %62 = arith.addf %60, %61 : vector<4x128xf32>
    %63 = math.tanh %62 : vector<4x128xf32>
    %64 = arith.negf %62 : vector<4x128xf32>
    %65 = math.exp %64 : vector<4x128xf32>
    %cst_17 = arith.constant 1.000000e+00 : f32
    %66 = vector.broadcast %cst_17 : f32 to vector<4x128xf32>
    %67 = arith.addf %66, %65 : vector<4x128xf32>
    %68 = arith.divf %66, %67 : vector<4x128xf32>
    %69 = arith.select %19, %63, %68 : vector<4x128xi1>, vector<4x128xf32>
    %70 = vector.extract_strided_slice %69 {offsets = [0, 0], sizes = [4, 32], strides = [1, 1]} : vector<4x128xf32> to vector<4x32xf32>
    %71 = vector.extract_strided_slice %69 {offsets = [0, 32], sizes = [4, 32], strides = [1, 1]} : vector<4x128xf32> to vector<4x32xf32>
    %72 = vector.extract_strided_slice %69 {offsets = [0, 64], sizes = [4, 32], strides = [1, 1]} : vector<4x128xf32> to vector<4x32xf32>
    %73 = vector.extract_strided_slice %69 {offsets = [0, 96], sizes = [4, 32], strides = [1, 1]} : vector<4x128xf32> to vector<4x32xf32>
    %74 = arith.mulf %71, %57 : vector<4x32xf32>
    %75 = arith.mulf %70, %72 : vector<4x32xf32>
    %76 = arith.addf %74, %75 : vector<4x32xf32>
    %77 = math.tanh %76 : vector<4x32xf32>
    %78 = arith.mulf %73, %77 : vector<4x32xf32>
    %79 = vector.extract_strided_slice %12 {offsets = [12, 0], sizes = [4, 128], strides = [1, 1]} : vector<32x128xf32> to vector<4x128xf32>
    %cst_18 = arith.constant dense<0.000000e+00> : vector<4x128xf32>
    %80 = tpu.matmul %78, %13, %cst_18 {dimension_numbers = #tpu.dot_dimension_numbers<[1], [0], [0], [1], [0, 0, 1, 1], [], []>} : vector<4x32xf32>, vector<32x128xf32>, vector<4x128xf32> -> vector<4x128xf32>
    %81 = arith.addf %79, %80 : vector<4x128xf32>
    %82 = math.tanh %81 : vector<4x128xf32>
    %83 = arith.negf %81 : vector<4x128xf32>
    %84 = math.exp %83 : vector<4x128xf32>
    %cst_19 = arith.constant 1.000000e+00 : f32
    %85 = vector.broadcast %cst_19 : f32 to vector<4x128xf32>
    %86 = arith.addf %85, %84 : vector<4x128xf32>
    %87 = arith.divf %85, %86 : vector<4x128xf32>
    %88 = arith.select %19, %82, %87 : vector<4x128xi1>, vector<4x128xf32>
    %89 = vector.extract_strided_slice %88 {offsets = [0, 0], sizes = [4, 32], strides = [1, 1]} : vector<4x128xf32> to vector<4x32xf32>
    %90 = vector.extract_strided_slice %88 {offsets = [0, 32], sizes = [4, 32], strides = [1, 1]} : vector<4x128xf32> to vector<4x32xf32>
    %91 = vector.extract_strided_slice %88 {offsets = [0, 64], sizes = [4, 32], strides = [1, 1]} : vector<4x128xf32> to vector<4x32xf32>
    %92 = vector.extract_strided_slice %88 {offsets = [0, 96], sizes = [4, 32], strides = [1, 1]} : vector<4x128xf32> to vector<4x32xf32>
    %93 = arith.mulf %90, %76 : vector<4x32xf32>
    %94 = arith.mulf %89, %91 : vector<4x32xf32>
    %95 = arith.addf %93, %94 : vector<4x32xf32>
    %96 = math.tanh %95 : vector<4x32xf32>
    %97 = arith.mulf %92, %96 : vector<4x32xf32>
    %98 = vector.extract_strided_slice %12 {offsets = [16, 0], sizes = [4, 128], strides = [1, 1]} : vector<32x128xf32> to vector<4x128xf32>
    %cst_20 = arith.constant dense<0.000000e+00> : vector<4x128xf32>
    %99 = tpu.matmul %97, %13, %cst_20 {dimension_numbers = #tpu.dot_dimension_numbers<[1], [0], [0], [1], [0, 0, 1, 1], [], []>} : vector<4x32xf32>, vector<32x128xf32>, vector<4x128xf32> -> vector<4x128xf32>
    %100 = arith.addf %98, %99 : vector<4x128xf32>
    %101 = math.tanh %100 : vector<4x128xf32>
    %102 = arith.negf %100 : vector<4x128xf32>
    %103 = math.exp %102 : vector<4x128xf32>
    %cst_21 = arith.constant 1.000000e+00 : f32
    %104 = vector.broadcast %cst_21 : f32 to vector<4x128xf32>
    %105 = arith.addf %104, %103 : vector<4x128xf32>
    %106 = arith.divf %104, %105 : vector<4x128xf32>
    %107 = arith.select %19, %101, %106 : vector<4x128xi1>, vector<4x128xf32>
    %108 = vector.extract_strided_slice %107 {offsets = [0, 0], sizes = [4, 32], strides = [1, 1]} : vector<4x128xf32> to vector<4x32xf32>
    %109 = vector.extract_strided_slice %107 {offsets = [0, 32], sizes = [4, 32], strides = [1, 1]} : vector<4x128xf32> to vector<4x32xf32>
    %110 = vector.extract_strided_slice %107 {offsets = [0, 64], sizes = [4, 32], strides = [1, 1]} : vector<4x128xf32> to vector<4x32xf32>
    %111 = vector.extract_strided_slice %107 {offsets = [0, 96], sizes = [4, 32], strides = [1, 1]} : vector<4x128xf32> to vector<4x32xf32>
    %112 = arith.mulf %109, %95 : vector<4x32xf32>
    %113 = arith.mulf %108, %110 : vector<4x32xf32>
    %114 = arith.addf %112, %113 : vector<4x32xf32>
    %115 = math.tanh %114 : vector<4x32xf32>
    %116 = arith.mulf %111, %115 : vector<4x32xf32>
    %117 = vector.extract_strided_slice %12 {offsets = [20, 0], sizes = [4, 128], strides = [1, 1]} : vector<32x128xf32> to vector<4x128xf32>
    %cst_22 = arith.constant dense<0.000000e+00> : vector<4x128xf32>
    %118 = tpu.matmul %116, %13, %cst_22 {dimension_numbers = #tpu.dot_dimension_numbers<[1], [0], [0], [1], [0, 0, 1, 1], [], []>} : vector<4x32xf32>, vector<32x128xf32>, vector<4x128xf32> -> vector<4x128xf32>
    %119 = arith.addf %117, %118 : vector<4x128xf32>
    %120 = math.tanh %119 : vector<4x128xf32>
    %121 = arith.negf %119 : vector<4x128xf32>
    %122 = math.exp %121 : vector<4x128xf32>
    %cst_23 = arith.constant 1.000000e+00 : f32
    %123 = vector.broadcast %cst_23 : f32 to vector<4x128xf32>
    %124 = arith.addf %123, %122 : vector<4x128xf32>
    %125 = arith.divf %123, %124 : vector<4x128xf32>
    %126 = arith.select %19, %120, %125 : vector<4x128xi1>, vector<4x128xf32>
    %127 = vector.extract_strided_slice %126 {offsets = [0, 0], sizes = [4, 32], strides = [1, 1]} : vector<4x128xf32> to vector<4x32xf32>
    %128 = vector.extract_strided_slice %126 {offsets = [0, 32], sizes = [4, 32], strides = [1, 1]} : vector<4x128xf32> to vector<4x32xf32>
    %129 = vector.extract_strided_slice %126 {offsets = [0, 64], sizes = [4, 32], strides = [1, 1]} : vector<4x128xf32> to vector<4x32xf32>
    %130 = vector.extract_strided_slice %126 {offsets = [0, 96], sizes = [4, 32], strides = [1, 1]} : vector<4x128xf32> to vector<4x32xf32>
    %131 = arith.mulf %128, %114 : vector<4x32xf32>
    %132 = arith.mulf %127, %129 : vector<4x32xf32>
    %133 = arith.addf %131, %132 : vector<4x32xf32>
    %134 = math.tanh %133 : vector<4x32xf32>
    %135 = arith.mulf %130, %134 : vector<4x32xf32>
    %136 = vector.extract_strided_slice %12 {offsets = [24, 0], sizes = [4, 128], strides = [1, 1]} : vector<32x128xf32> to vector<4x128xf32>
    %cst_24 = arith.constant dense<0.000000e+00> : vector<4x128xf32>
    %137 = tpu.matmul %135, %13, %cst_24 {dimension_numbers = #tpu.dot_dimension_numbers<[1], [0], [0], [1], [0, 0, 1, 1], [], []>} : vector<4x32xf32>, vector<32x128xf32>, vector<4x128xf32> -> vector<4x128xf32>
    %138 = arith.addf %136, %137 : vector<4x128xf32>
    %139 = math.tanh %138 : vector<4x128xf32>
    %140 = arith.negf %138 : vector<4x128xf32>
    %141 = math.exp %140 : vector<4x128xf32>
    %cst_25 = arith.constant 1.000000e+00 : f32
    %142 = vector.broadcast %cst_25 : f32 to vector<4x128xf32>
    %143 = arith.addf %142, %141 : vector<4x128xf32>
    %144 = arith.divf %142, %143 : vector<4x128xf32>
    %145 = arith.select %19, %139, %144 : vector<4x128xi1>, vector<4x128xf32>
    %146 = vector.extract_strided_slice %145 {offsets = [0, 0], sizes = [4, 32], strides = [1, 1]} : vector<4x128xf32> to vector<4x32xf32>
    %147 = vector.extract_strided_slice %145 {offsets = [0, 32], sizes = [4, 32], strides = [1, 1]} : vector<4x128xf32> to vector<4x32xf32>
    %148 = vector.extract_strided_slice %145 {offsets = [0, 64], sizes = [4, 32], strides = [1, 1]} : vector<4x128xf32> to vector<4x32xf32>
    %149 = vector.extract_strided_slice %145 {offsets = [0, 96], sizes = [4, 32], strides = [1, 1]} : vector<4x128xf32> to vector<4x32xf32>
    %150 = arith.mulf %147, %133 : vector<4x32xf32>
    %151 = arith.mulf %146, %148 : vector<4x32xf32>
    %152 = arith.addf %150, %151 : vector<4x32xf32>
    %153 = math.tanh %152 : vector<4x32xf32>
    %154 = arith.mulf %149, %153 : vector<4x32xf32>
    %155 = vector.extract_strided_slice %12 {offsets = [28, 0], sizes = [4, 128], strides = [1, 1]} : vector<32x128xf32> to vector<4x128xf32>
    %cst_26 = arith.constant dense<0.000000e+00> : vector<4x128xf32>
    %156 = tpu.matmul %154, %13, %cst_26 {dimension_numbers = #tpu.dot_dimension_numbers<[1], [0], [0], [1], [0, 0, 1, 1], [], []>} : vector<4x32xf32>, vector<32x128xf32>, vector<4x128xf32> -> vector<4x128xf32>
    %157 = arith.addf %155, %156 : vector<4x128xf32>
    %158 = math.tanh %157 : vector<4x128xf32>
    %159 = arith.negf %157 : vector<4x128xf32>
    %160 = math.exp %159 : vector<4x128xf32>
    %cst_27 = arith.constant 1.000000e+00 : f32
    %161 = vector.broadcast %cst_27 : f32 to vector<4x128xf32>
    %162 = arith.addf %161, %160 : vector<4x128xf32>
    %163 = arith.divf %161, %162 : vector<4x128xf32>
    %164 = arith.select %19, %158, %163 : vector<4x128xi1>, vector<4x128xf32>
    %165 = vector.extract_strided_slice %164 {offsets = [0, 0], sizes = [4, 32], strides = [1, 1]} : vector<4x128xf32> to vector<4x32xf32>
    %166 = vector.extract_strided_slice %164 {offsets = [0, 32], sizes = [4, 32], strides = [1, 1]} : vector<4x128xf32> to vector<4x32xf32>
    %167 = vector.extract_strided_slice %164 {offsets = [0, 64], sizes = [4, 32], strides = [1, 1]} : vector<4x128xf32> to vector<4x32xf32>
    %168 = vector.extract_strided_slice %164 {offsets = [0, 96], sizes = [4, 32], strides = [1, 1]} : vector<4x128xf32> to vector<4x32xf32>
    %169 = arith.mulf %166, %152 : vector<4x32xf32>
    %170 = arith.mulf %165, %167 : vector<4x32xf32>
    %171 = arith.addf %169, %170 : vector<4x32xf32>
    %172 = math.tanh %171 : vector<4x32xf32>
    %173 = arith.mulf %168, %172 : vector<4x32xf32>
    %174 = arith.mulf %40, %173 : vector<4x32xf32>
    %cst_28 = arith.constant dense<0.000000e+00> : vector<4xf32>
    %175 = vector.multi_reduction <add>, %174, %cst_28 [1] : vector<4x32xf32> to vector<4xf32>
    %176 = vector.shape_cast %175 : vector<4xf32> to vector<4x1xf32>
    %177 = arith.mulf %59, %173 : vector<4x32xf32>
    %cst_29 = arith.constant dense<0.000000e+00> : vector<4xf32>
    %178 = vector.multi_reduction <add>, %177, %cst_29 [1] : vector<4x32xf32> to vector<4xf32>
    %179 = vector.shape_cast %178 : vector<4xf32> to vector<4x1xf32>
    %180 = arith.mulf %78, %173 : vector<4x32xf32>
    %cst_30 = arith.constant dense<0.000000e+00> : vector<4xf32>
    %181 = vector.multi_reduction <add>, %180, %cst_30 [1] : vector<4x32xf32> to vector<4xf32>
    %182 = vector.shape_cast %181 : vector<4xf32> to vector<4x1xf32>
    %183 = arith.mulf %97, %173 : vector<4x32xf32>
    %cst_31 = arith.constant dense<0.000000e+00> : vector<4xf32>
    %184 = vector.multi_reduction <add>, %183, %cst_31 [1] : vector<4x32xf32> to vector<4xf32>
    %185 = vector.shape_cast %184 : vector<4xf32> to vector<4x1xf32>
    %186 = arith.mulf %116, %173 : vector<4x32xf32>
    %cst_32 = arith.constant dense<0.000000e+00> : vector<4xf32>
    %187 = vector.multi_reduction <add>, %186, %cst_32 [1] : vector<4x32xf32> to vector<4xf32>
    %188 = vector.shape_cast %187 : vector<4xf32> to vector<4x1xf32>
    %189 = arith.mulf %135, %173 : vector<4x32xf32>
    %cst_33 = arith.constant dense<0.000000e+00> : vector<4xf32>
    %190 = vector.multi_reduction <add>, %189, %cst_33 [1] : vector<4x32xf32> to vector<4xf32>
    %191 = vector.shape_cast %190 : vector<4xf32> to vector<4x1xf32>
    %192 = arith.mulf %154, %173 : vector<4x32xf32>
    %cst_34 = arith.constant dense<0.000000e+00> : vector<4xf32>
    %193 = vector.multi_reduction <add>, %192, %cst_34 [1] : vector<4x32xf32> to vector<4xf32>
    %194 = vector.shape_cast %193 : vector<4xf32> to vector<4x1xf32>
    %195 = arith.mulf %173, %173 : vector<4x32xf32>
    %cst_35 = arith.constant dense<0.000000e+00> : vector<4xf32>
    %196 = vector.multi_reduction <add>, %195, %cst_35 [1] : vector<4x32xf32> to vector<4xf32>
    %197 = vector.shape_cast %196 : vector<4xf32> to vector<4x1xf32>
    %198 = tpu.concatenate %176, %179, %182, %185, %188, %191, %194, %197 in 1 : vector<4x1xf32>, vector<4x1xf32>, vector<4x1xf32>, vector<4x1xf32>, vector<4x1xf32>, vector<4x1xf32>, vector<4x1xf32>, vector<4x1xf32> -> vector<4x8xf32>
    %cst_36 = arith.constant dense<0xFF800000> : vector<4xf32>
    %199 = vector.multi_reduction <maximumf>, %198, %cst_36 [1] : vector<4x8xf32> to vector<4xf32>
    %200 = vector.shape_cast %199 : vector<4xf32> to vector<4x1xf32>
    %201 = vector.broadcast %200 : vector<4x1xf32> to vector<4x8xf32>
    %202 = arith.subf %198, %201 : vector<4x8xf32>
    %203 = math.exp %202 : vector<4x8xf32>
    %cst_37 = arith.constant dense<0.000000e+00> : vector<4xf32>
    %204 = vector.multi_reduction <add>, %203, %cst_37 [1] : vector<4x8xf32> to vector<4xf32>
    %205 = vector.shape_cast %204 : vector<4xf32> to vector<4x1xf32>
    %206 = vector.broadcast %205 : vector<4x1xf32> to vector<4x8xf32>
    %207 = arith.divf %203, %206 : vector<4x8xf32>
    %208 = vector.extract_strided_slice %207 {offsets = [0, 0], sizes = [4, 1], strides = [1, 1]} : vector<4x8xf32> to vector<4x1xf32>
    %209 = vector.broadcast %208 : vector<4x1xf32> to vector<4x32xf32>
    %210 = arith.mulf %209, %40 : vector<4x32xf32>
    %211 = vector.extract_strided_slice %207 {offsets = [0, 1], sizes = [4, 1], strides = [1, 1]} : vector<4x8xf32> to vector<4x1xf32>
    %212 = vector.broadcast %211 : vector<4x1xf32> to vector<4x32xf32>
    %213 = arith.mulf %212, %59 : vector<4x32xf32>
    %214 = arith.addf %210, %213 : vector<4x32xf32>
    %215 = vector.extract_strided_slice %207 {offsets = [0, 2], sizes = [4, 1], strides = [1, 1]} : vector<4x8xf32> to vector<4x1xf32>
    %216 = vector.broadcast %215 : vector<4x1xf32> to vector<4x32xf32>
    %217 = arith.mulf %216, %78 : vector<4x32xf32>
    %218 = arith.addf %214, %217 : vector<4x32xf32>
    %219 = vector.extract_strided_slice %207 {offsets = [0, 3], sizes = [4, 1], strides = [1, 1]} : vector<4x8xf32> to vector<4x1xf32>
    %220 = vector.broadcast %219 : vector<4x1xf32> to vector<4x32xf32>
    %221 = arith.mulf %220, %97 : vector<4x32xf32>
    %222 = arith.addf %218, %221 : vector<4x32xf32>
    %223 = vector.extract_strided_slice %207 {offsets = [0, 4], sizes = [4, 1], strides = [1, 1]} : vector<4x8xf32> to vector<4x1xf32>
    %224 = vector.broadcast %223 : vector<4x1xf32> to vector<4x32xf32>
    %225 = arith.mulf %224, %116 : vector<4x32xf32>
    %226 = arith.addf %222, %225 : vector<4x32xf32>
    %227 = vector.extract_strided_slice %207 {offsets = [0, 5], sizes = [4, 1], strides = [1, 1]} : vector<4x8xf32> to vector<4x1xf32>
    %228 = vector.broadcast %227 : vector<4x1xf32> to vector<4x32xf32>
    %229 = arith.mulf %228, %135 : vector<4x32xf32>
    %230 = arith.addf %226, %229 : vector<4x32xf32>
    %231 = vector.extract_strided_slice %207 {offsets = [0, 6], sizes = [4, 1], strides = [1, 1]} : vector<4x8xf32> to vector<4x1xf32>
    %232 = vector.broadcast %231 : vector<4x1xf32> to vector<4x32xf32>
    %233 = arith.mulf %232, %154 : vector<4x32xf32>
    %234 = arith.addf %230, %233 : vector<4x32xf32>
    %235 = vector.extract_strided_slice %207 {offsets = [0, 7], sizes = [4, 1], strides = [1, 1]} : vector<4x8xf32> to vector<4x1xf32>
    %236 = vector.broadcast %235 : vector<4x1xf32> to vector<4x32xf32>
    %237 = arith.mulf %236, %173 : vector<4x32xf32>
    %238 = arith.addf %234, %237 : vector<4x32xf32>
    %c0_38 = arith.constant 0 : index
    %c0_39 = arith.constant 0 : index
    %239 = vector.load %arg5[%c0_38, %c0_39] : memref<4x32xf32, #tpu.memory_space<vmem>>, vector<4x32xf32>
    tpu.vector_store %arg5[%c0_38, %c0_39], %238 {strides = array<i32>} : memref<4x32xf32, #tpu.memory_space<vmem>>, vector<4x32xf32>,
    return
  }
}

</mosaic_0001>

<bundles_post_ra>
// kernel: siamese_forward.1
= control target key start
LH: loop header
LB: loop body
LE: loop exit
PB: predicated region body
PF: predicated region fallthrough
CT: control target
= control target key end

     0   :  { %v1706_v0 = vmov 0.0|0.0   ;;  %vm1707_vm0 = vmmov 0   ;;  %v1708_v3 = vmov 0.0   ;;  %v1709_v5 = vmov 0   ;;  %s1711_s25 = smov 32   ;;  %s2038_s2 = inlined_call_operand.vmem [shape: f32[16,128], index: 2, kind: input, shape index: {}]   ;;  %s2039_s1 = inlined_call_operand.vmem [shape: f32[50,16], index: 1, kind: input, shape index: {}]   ;;  %s2040_s0 = inlined_call_operand.vmem [shape: s32[32,1], index: 0, kind: input, shape index: {}]   ;;  %s2041_s3 = inlined_call_operand.vmem [shape: f32[32,128], index: 3, kind: input, shape index: {}]   ;;  %s2042_s4 = inlined_call_operand.vmem [shape: f32[1,128], index: 4, kind: input, shape index: {}]   ;;  %s2043_s5 = inlined_call_operand.vmem [shape: f32[4,32], index: 5, kind: output, shape index: {}]  }
   0x1   :  { %1551 = vmatprep.subr.bf16.mxu0 %v1706_v0  ;;  %v27_v1 = vld [vmem:[%s2038_s2] sm:$0xff]  ;;  %v28_v2 = vld [vmem:[%s2038_s2 + $0x8] sm:$0xff]  ;;  %1422 = vmatprep.mubr.msk.f32.mxu0 %vm1707_vm0, %v1708_v3  ;;  %vm29_vm1 = vcmask 130048   ;;  %v155_v8 = vld [vmem:[%s2040_s0 + $0x10] sm:$0xff]  ;;  %v151_v23 = vlaneseq  ;;  %vm188_vm2 = vcmask 408576   ;;  %vm201_vm4 = vcmask 1041408  }
   0x2   :  { %v1552_v4 = vpack.c.bf16 %v28_v2, %v27_v1  ;;  %1628 = vset.pattern.permute.xlu0 %v1709_v5  ;;  %1629 = vset.pattern.permute.xlu1 %v1709_v5  ;;  %v20_v6 = vld [vmem:[%s2039_s1] sm:$0xff]  ;;  %v154_v9 = vld [vmem:[%s2040_s0 + $0x8] sm:$0xff]  ;;  %v156_v10 = vld [vmem:[%s2040_s0 + $0x18] sm:$0xff]  ;;  %vm297_vm11 = vcmask 261120   ;;  %vm1157_vm12 = vcmask 261124   ;;  %vm1148_vm13 = vcmask 257024  }
   0x3   :  { %v153_v7 = vld [vmem:[%s2040_s0] sm:$0xff]  ;;  %164 = vperm.xlu1 %1629, %v155_v8   ;;  %v21_v11 = vld [vmem:[%s2039_s1 + $0x8] sm:$0xff]  ;;  %v22_v12 = vld [vmem:[%s2039_s1 + $0x10] sm:$0xff]  ;;  %v1834_v24 = vand.u32 127, %v151_v23  ;;  %vm1221_vm14 = vcmask 7168   ;;  %vm1223_vm15 = vcmask 15360  }
   0x4   :  { %1553 = vmatpush3.bf16.msra.mxu0 %v1552_v4  ;;  %158 = vperm.xlu0 %1628, %v153_v7   ;;  %v23_v13 = vld [vmem:[%s2039_s1 + $0x18] sm:$0xff]  ;;  %v24_v14 = vld [vmem:[%s2039_s1 + $0x20] sm:$0xff]  ;;  %v25_v15 = vld [vmem:[%s2039_s1 + $0x28] sm:$0xff]  ;;  %s1719_s2 = smov 96  }
   0x5   :  { %1578 = vmatprep.subr.bf16.mxu0 %v1706_v0  ;;  %v26_v16 = vld [vmem:[%s2039_s1 + $0x30] sm:$0x3]  ;;  %v290_v17 = vld [vmem:[%s2041_s3] sm:$0xff]  ;;  %v291_v18 = vld [vmem:[%s2041_s3 + $0x8] sm:$0xff]  ;;  %vm294_vm8 = vcmp.ge.s32.totalorder %v1834_v24, 64  ;;  %vm295_vm9 = vcmp.lt.s32.totalorder %v1834_v24, 96 }
   0x6   :  { %v1820_v19 = vpack.c.bf16 %v291_v18, %v290_v17  ;;  %v292_v20 = vld [vmem:[%s2041_s3 + $0x10] sm:$0xff]  ;;  %v293_v21 = vld [vmem:[%s2041_s3 + $0x18] sm:$0xff]  ;;  %v1337_v50 = vld [vmem:[%s2042_s4] ss:$0 sm:$0xff]  ;;  %s1710_s4 = smov 64  }
   0x7   :  { %1423 = vmatmul.mubr.msk.f32.vlgmr.msra.gmra.mrb[0].mxu0 %vm29_vm1, %v20_v6  ;;  %167 = vperm.xlu1 %1629, %v156_v10   ;;  %v1830_v22 = vpack.c.bf16 %v293_v21, %v292_v20  ;;  %vm1873_vm10 = vmand %vm294_vm8, %vm295_vm9 }
   0x8   :  { %1425 = vmatprep.mubr.msk.f32.mxu0 %vm1707_vm0, %v1708_v3  ;;  %161 = vperm.xlu0 %1628, %v154_v9  }
   0x9   :  { %1580 = vmatpush3.bf16.msra.mxu0 %v1820_v19 }
   0xa   :  { %1581 = vmatprep.subr.bf16.mxu0 %v1706_v0 }
   0xb   :  { %1426 = vmatmul.mubr.msk.f32.gmra.mrb[2].mxu0 %vm29_vm1, %v21_v11 }
   0xc   :  { %1428 = vmatprep.mubr.msk.f32.mxu0 %vm1707_vm0, %v1708_v3 }
   0xd   :  { %1583 = vmatpush3.bf16.msra.mxu0 %v1830_v22 }
   0xe   :  { %1590 = vmatprep.subr.bf16.mxu0 %v1706_v0 }
   0xf   :  { %1429 = vmatmul.mubr.msk.f32.gmra.mrb[4].mxu0 %vm29_vm1, %v22_v12 }
  0x10   :  { %1431 = vmatprep.mubr.msk.f32.mxu0 %vm1707_vm0, %v1708_v3 }
  0x13   :  { %1432 = vmatmul.mubr.msk.f32.gmra.mrb[6].mxu0 %vm29_vm1, %v23_v13 }
  0x14   :  { %1434 = vmatprep.mubr.msk.f32.mxu0 %vm1707_vm0, %v1708_v3 }
  0x17   :  { %1435 = vmatmul.mubr.msk.f32.gmra.mrb[8].mxu0 %vm29_vm1, %v24_v14 }
  0x18   :  { %1437 = vmatprep.mubr.msk.f32.mxu0 %vm1707_vm0, %v1708_v3 }
  0x1b   :  { %1438 = vmatmul.mubr.msk.f32.gmra.mrb[10].mxu0 %vm29_vm1, %v25_v15 }
  0x1c   :  { %1440 = vmatprep.mubr.msk.f32.mxu0 %vm1707_vm0, %v1708_v3 }
  0x1f   :  { %1441 = vmatmul.mubr.msk.f32.gmra.mrb[12].mxu0 %vm29_vm1, %v26_v16  ;;  %vm1227_vm1 = vcmask 31744  }
  0x20   :  { %1493 = vmatprep.mubr.msk.f32.mxu0 %vm1707_vm0, %v1708_v3 }
  0x82   :  { %v165_v40 = vpop.permute.xlu1 %164 }
  0x83   :  { %v159_v25 = vpop.permute.xlu0 %158  ;;  %vm171_vm5 = vcmp.eq.s32.totalorder %v1834_v24, %v165_v40 }
  0x84   :  { %vm169_vm3 = vcmp.eq.s32.totalorder %v1834_v24, %v159_v25  ;;  %v1335_v47 = vsel %vm171_vm5, 1.0, %v1708_v3  ;;  %vm1235_vm5 = vcmask 60416  }
  0x85   :  { %v1333_v26 = vsel %vm169_vm3, 1.0, %v1708_v3  ;;  %vm1231_vm3 = vcmask 48128  }
  0x86   :  { %1457 = vmatprep.mubr.msk.f32.mxu1 %vm188_vm2, %v1333_v26  ;;  %v168_v46 = vpop.permute.xlu1 %167 }
  0x87   :  { %v162_v43 = vpop.permute.xlu0 %161  ;;  %vm172_vm7 = vcmp.eq.s32.totalorder %v1834_v24, %v168_v46 }
  0x88   :  { %vm170_vm6 = vcmp.eq.s32.totalorder %v1834_v24, %v162_v43  ;;  %v1336_v49 = vsel %vm172_vm7, 1.0, %v1708_v3 }
  0x89   :  { %v1334_v48 = vsel %vm170_vm6, 1.0, %v1708_v3 }
  0xda   :  { %v117_v27 = vpop.f32.mrb[0].mxu0 }
  0xdb   :  { %v1424_v28 = vpop.f32.mrb[1].mxu0 }
  0xde   :  { %v122_v29 = vpop.f32.mrb[2].mxu0 }
  0xdf   :  { %v1554_v30 = vpack.c.bf16 %v122_v29, %v117_v27  ;;  %v1427_v31 = vpop.f32.mrb[3].mxu0 }
  0xe1   :  { %1555 = vmatprep.subr.bf16.mxu1 %v1554_v30 }
  0xe2   :  { %v127_v32 = vpop.f32.mrb[4].mxu0  ;;  %1557 = vmatpush3.bf16.msra.mxu1 %v1554_v30 }
  0xe3   :  { %v1430_v33 = vpop.f32.mrb[5].mxu0 }
  0xe6   :  { %v132_v34 = vpop.f32.mrb[6].mxu0 }
  0xe7   :  { %v1558_v35 = vpack.c.bf16 %v132_v34, %v127_v32  ;;  %v1433_v36 = vpop.f32.mrb[7].mxu0 }
  0xe9   :  { %1559 = vmatprep.subr.bf16.mxu1 %v1558_v35 }
  0xea   :  { %v137_v37 = vpop.f32.mrb[8].mxu0  ;;  %1561 = vmatpush3.bf16.msra.mxu1 %v1558_v35 }
  0xeb   :  { %v1436_v38 = vpop.f32.mrb[9].mxu0 }
  0xee   :  { %v142_v39 = vpop.f32.mrb[10].mxu0 }
  0xef   :  { %v1562_v41 = vpack.c.bf16 %v142_v39, %v137_v37  ;;  %v1439_v42 = vpop.f32.mrb[11].mxu0 }
  0xf1   :  { %1563 = vmatprep.subr.bf16.mxu1 %v1562_v41 }
  0xf2   :  { %1565 = vmatpush3.bf16.msra.mxu1 %v1562_v41  ;;  %v147_v44 = vpop.f32.mrb[12].mxu0 }
  0xf3   :  { %v1442_v45 = vpop.f32.mrb[13].mxu0  ;;  %1455 = vmatprep.subr.msk.mxu1 %vm201_vm4, %v147_v44 }
  0xf6   :  { %1456 = vmatpush3.msk.msra.mxu1 %vm201_vm4, %v147_v44  ;;  %vm1233_vm4 = vcmask 56320  }
  0xf7   :  { %1458 = vmatmul.mubr.msk.f32.vlgmr.msra.gmra.mrb[0].mxu1 %vm188_vm2, %v1334_v48  ;;  %1566 = vmatprep.subr.bf16.mxu1 %v1706_v0 }
  0xf8   :  { %1460 = vmatprep.mubr.msk.f32.mxu1 %vm188_vm2, %v1335_v47  ;;  %1568 = vmatpush3.bf16.msra.mxu1 %v1820_v19 }
  0xf9   :  { %1569 = vmatprep.subr.bf16.mxu1 %v1706_v0 }
  0xfb   :  { %1461 = vmatmul.mubr.msk.f32.gmra.mrb[2].mxu1 %vm188_vm2, %v1336_v49  ;;  %vm1229_vm2 = vcmask 39936  }
  0xfc   :  { %1571 = vmatpush3.bf16.msra.mxu1 %v1830_v22  ;;  %1471 = vmatprep.mubr.msk.f32.mxu1 %vm1707_vm0, %v1708_v3 }
  0xfd   :  { %1572 = vmatprep.subr.bf16.mxu1 %v1706_v0 }
  0xff   :  { %1472 = vmatmul.mubr.f32.vlgmr.msra.gmra.mrb[4].mxu1 %v1708_v3 }
 0x100   :  { %1574 = vmatpush3.bf16.msra.mxu1 %v1820_v19  ;;  %1482 = vmatprep.mubr.msk.f32.mxu1 %vm1707_vm0, %v1708_v3 }
 0x101   :  { %1575 = vmatprep.subr.bf16.mxu1 %v1706_v0 }
 0x104   :  { %1577 = vmatpush3.bf16.msra.mxu1 %v1830_v22 }
 0x105   :  { %1584 = vmatprep.subr.bf16.mxu1 %v1706_v0 }
 0x1ca   :  { %v1459_v51 = vpop.f32.mrb[0].mxu1 }
 0x1cb   :  { %v1865_v52 = vadd.f32 %v1459_v51, %v1337_v50  ;;  %v271_v53 = vpop.f32.mrb[1].mxu1 }
 0x1cc   :  { %v272_v58 = vadd.f32 %v1337_v50, %v271_v53 }
 0x1ce   :  { %v1462_v54 = vpop.f32.mrb[2].mxu1 }
 0x1cf   :  { %v1867_v55 = vadd.f32 %v1462_v54, %v1337_v50  ;;  %v281_v56 = vpop.f32.mrb[3].mxu1 }
 0x1d0   :  { %v1869_v57 = vadd.f32 %v1337_v50, %v281_v56 }
 0x1d2   :  { %v367_v59 = vpop.f32.mrb[4].mxu1 }
 0x1d3   :  { %v371_v60 = vadd.f32 %v367_v59, %v272_v58  ;;  %v1473_v61 = vpop.f32.mrb[5].mxu1 }
 0x1d5   :  { %v1343_v62 = vmul.f32 -1.442695, %v371_v60 }
 0x1d7   :  { %1638 = vpow2.f32 %v1343_v62 }
 0x1d8   :  { %1640 = vtanh.f32 %v371_v60 }
 0x1e1   :  { %v1639_v63 = vpop.eup %1638 }
 0x1e2   :  { %v376_v1 = vadd.f32 1.0, %v1639_v63  ;;  %v1641_v4 = vpop.eup %1640 }
 0x1e4   :  { %1642 = vrcp.f32 %v376_v1 }
 0x1ee   :  { %v1643_v5 = vpop.eup %1642 }
 0x1ef   :  { %v379_v6 = vsel %vm1873_vm10, %v1641_v4, %v1643_v5 }
 0x1f0   :  { %382 = vrot.lane.b32.xlu0 %v379_v6, %s1710_s4  ;;  %v380_v9 = vmul.f32 0.0, %v379_v6 }
 0x262   :  { %v383_v7 = vpop.permute.xlu0 %382 }
 0x263   :  { %v385_v8 = vmul.f32 %v383_v7, %v379_v6 }
 0x265   :  { %387 = vrot.lane.b32.xlu1 %v385_v8, %s1711_s25 }
 0x2d7   :  { %v388_v10 = vpop.permute.xlu1 %387 }
 0x2d8   :  { %v390_v11 = vadd.f32 %v388_v10, %v380_v9 }
 0x2da   :  { %1644 = vtanh.f32 %v390_v11  ;;  %v485_v30 = vrot.slane %v390_v11, 4 }
 0x2e4   :  { %v1645_v12 = vpop.eup %1644 }
 0x2e5   :  { %393 = vrot.lane.b32.xlu0 %v1645_v12, %s1710_s4 }
 0x357   :  { %v394_v13 = vpop.permute.xlu0 %393 }
 0x358   :  { %v1882_v14 = vmul.f32 %v394_v13, %v379_v6 }
 0x35a   :  { %398 = vrot.lane.b32.xlu1 %v1882_v14, %s1711_s25 }
 0x3cc   :  { %v399_v15 = vpop.permute.xlu1 %398 }
 0x3cd   :  { %1483 = vmatmul.mubr.msk.f32.vlgmr.msra.gmra.mrb[6].mxu1 %vm297_vm11, %v399_v15 }
 0x3ce   :  { %1586 = vmatpush3.bf16.msra.mxu1 %v1820_v19  ;;  %1504 = vmatprep.mubr.msk.f32.mxu1 %vm1707_vm0, %v1708_v3 }
 0x3cf   :  { %1587 = vmatprep.subr.bf16.mxu1 %v1706_v0 }
 0x3d2   :  { %1589 = vmatpush3.bf16.msra.mxu1 %v1830_v22 }
 0x3d3   :  { %1596 = vmatprep.subr.bf16.mxu1 %v1706_v0 }
 0x4a0   :  { %v468_v16 = vpop.f32.mrb[6].mxu1 }
 0x4a1   :  { %v473_v17 = vrot.slane %v468_v16, 4  ;;  %v1484_v18 = vpop.f32.mrb[7].mxu1 }
 0x4a3   :  { %v475_v20 = vadd.f32 %v473_v17, %v272_v58 }
 0x4a5   :  { %v1345_v21 = vmul.f32 -1.442695, %v475_v20 }
 0x4a7   :  { %1646 = vpow2.f32 %v1345_v21 }
 0x4a8   :  { %1648 = vtanh.f32 %v475_v20 }
 0x4b1   :  { %v1647_v23 = vpop.eup %1646 }
 0x4b2   :  { %v480_v24 = vadd.f32 1.0, %v1647_v23  ;;  %v1649_v25 = vpop.eup %1648 }
 0x4b4   :  { %1650 = vrcp.f32 %v480_v24 }
 0x4be   :  { %v1651_v26 = vpop.eup %1650 }
 0x4bf   :  { %v483_v27 = vsel %vm1873_vm10, %v1649_v25, %v1651_v26 }
 0x4c0   :  { %489 = vrot.lane.b32.xlu0 %v483_v27, %s1710_s4  ;;  %v487_v31 = vmul.f32 %v485_v30, %v483_v27 }
 0x532   :  { %v490_v28 = vpop.permute.xlu0 %489 }
 0x533   :  { %v492_v29 = vmul.f32 %v490_v28, %v483_v27 }
 0x535   :  { %494 = vrot.lane.b32.xlu1 %v492_v29, %s1711_s25 }
 0x5a7   :  { %v495_v32 = vpop.permute.xlu1 %494 }
 0x5a8   :  { %v497_v33 = vadd.f32 %v495_v32, %v487_v31 }
 0x5aa   :  { %1652 = vtanh.f32 %v497_v33  ;;  %v590_v50 = vrot.slane %v497_v33, 4 }
 0x5b4   :  { %v1653_v34 = vpop.eup %1652 }
 0x5b5   :  { %500 = vrot.lane.b32.xlu0 %v1653_v34, %s1710_s4 }
 0x627   :  { %v501_v35 = vpop.permute.xlu0 %500 }
 0x628   :  { %v1898_v36 = vmul.f32 %v501_v35, %v483_v27 }
 0x62a   :  { %v505_v37 = vrot.slane %v1898_v36, 4 }
 0x62c   :  { %506 = vrot.lane.b32.xlu1 %v505_v37, %s1711_s25 }
 0x69e   :  { %v1902_v38 = vpop.permute.xlu1 %506 }
 0x69f   :  { %1494 = vmatmul.mubr.msk.f32.vlgmr.msra.gmra.mrb[14].mxu0 %vm297_vm11, %v1902_v38 }
 0x6a0   :  { %1592 = vmatpush3.bf16.msra.mxu0 %v1820_v19  ;;  %1515 = vmatprep.mubr.msk.f32.mxu0 %vm1707_vm0, %v1708_v3 }
 0x6a1   :  { %1593 = vmatprep.subr.bf16.mxu0 %v1706_v0 }
 0x6a4   :  { %1595 = vmatpush3.bf16.msra.mxu0 %v1830_v22 }
 0x6a5   :  { %1602 = vmatprep.subr.bf16.mxu0 %v1706_v0 }
 0x772   :  { %v576_v39 = vpop.f32.mrb[14].mxu0 }
 0x773   :  { %v580_v40 = vadd.f32 %v576_v39, %v1865_v52  ;;  %v1495_v41 = vpop.f32.mrb[15].mxu0 }
 0x775   :  { %v1347_v42 = vmul.f32 -1.442695, %v580_v40 }
 0x777   :  { %1654 = vpow2.f32 %v1347_v42 }
 0x778   :  { %1656 = vtanh.f32 %v580_v40 }
 0x781   :  { %v1655_v43 = vpop.eup %1654 }
 0x782   :  { %v585_v44 = vadd.f32 1.0, %v1655_v43  ;;  %v1657_v45 = vpop.eup %1656 }
 0x784   :  { %1658 = vrcp.f32 %v585_v44 }
 0x78e   :  { %v1659_v46 = vpop.eup %1658 }
 0x78f   :  { %v588_v47 = vsel %vm1873_vm10, %v1657_v45, %v1659_v46 }
 0x790   :  { %594 = vrot.lane.b32.xlu0 %v588_v47, %s1710_s4  ;;  %v592_v51 = vmul.f32 %v590_v50, %v588_v47 }
 0x802   :  { %v595_v48 = vpop.permute.xlu0 %594 }
 0x803   :  { %v597_v49 = vmul.f32 %v595_v48, %v588_v47 }
 0x805   :  { %599 = vrot.lane.b32.xlu1 %v597_v49, %s1711_s25 }
 0x877   :  { %v600_v53 = vpop.permute.xlu1 %599 }
 0x878   :  { %v602_v54 = vadd.f32 %v600_v53, %v592_v51 }
 0x87a   :  { %1660 = vtanh.f32 %v602_v54  ;;  %v697_v12 = vrot.slane %v602_v54, 4 }
 0x884   :  { %v1661_v56 = vpop.eup %1660 }
 0x885   :  { %605 = vrot.lane.b32.xlu0 %v1661_v56, %s1710_s4 }
 0x8f7   :  { %v606_v58 = vpop.permute.xlu0 %605 }
 0x8f8   :  { %v1918_v59 = vmul.f32 %v606_v58, %v588_v47 }
 0x8fa   :  { %610 = vrot.lane.b32.xlu1 %v1918_v59, %s1711_s25 }
 0x96c   :  { %v611_v60 = vpop.permute.xlu1 %610 }
 0x96d   :  { %1505 = vmatmul.mubr.msk.f32.vlgmr.msra.gmra.mrb[8].mxu1 %vm297_vm11, %v611_v60 }
 0x96e   :  { %1598 = vmatpush3.bf16.msra.mxu1 %v1820_v19  ;;  %1526 = vmatprep.mubr.msk.f32.mxu1 %vm1707_vm0, %v1708_v3 }
 0x96f   :  { %1599 = vmatprep.subr.bf16.mxu1 %v1706_v0 }
 0x972   :  { %1601 = vmatpush3.bf16.msra.mxu1 %v1830_v22 }
 0x973   :  { %1608 = vmatprep.subr.bf16.mxu1 %v1706_v0 }
 0xa40   :  { %v680_v61 = vpop.f32.mrb[8].mxu1 }
 0xa41   :  { %v685_v62 = vrot.slane %v680_v61, 4  ;;  %v1506_v63 = vpop.f32.mrb[9].mxu1 }
 0xa43   :  { %v687_v1 = vadd.f32 %v685_v62, %v1865_v52 }
 0xa45   :  { %v1349_v4 = vmul.f32 -1.442695, %v687_v1 }
 0xa47   :  { %1662 = vpow2.f32 %v1349_v4 }
 0xa48   :  { %1664 = vtanh.f32 %v687_v1 }
 0xa51   :  { %v1663_v5 = vpop.eup %1662 }
 0xa52   :  { %v692_v6 = vadd.f32 1.0, %v1663_v5  ;;  %v1665_v7 = vpop.eup %1664 }
 0xa54   :  { %1666 = vrcp.f32 %v692_v6 }
 0xa5e   :  { %v1667_v8 = vpop.eup %1666 }
 0xa5f   :  { %v695_v9 = vsel %vm1873_vm10, %v1665_v7, %v1667_v8 }
 0xa60   :  { %701 = vrot.lane.b32.xlu0 %v695_v9, %s1710_s4  ;;  %v699_v13 = vmul.f32 %v697_v12, %v695_v9 }
 0xad2   :  { %v702_v10 = vpop.permute.xlu0 %701 }
 0xad3   :  { %v704_v11 = vmul.f32 %v702_v10, %v695_v9 }
 0xad5   :  { %706 = vrot.lane.b32.xlu1 %v704_v11, %s1711_s25 }
 0xb47   :  { %v707_v52 = vpop.permute.xlu1 %706 }
 0xb48   :  { %v709_v15 = vadd.f32 %v707_v52, %v699_v13 }
 0xb4a   :  { %1668 = vtanh.f32 %v709_v15  ;;  %v802_v34 = vrot.slane %v709_v15, 4 }
 0xb54   :  { %v1669_v16 = vpop.eup %1668 }
 0xb55   :  { %712 = vrot.lane.b32.xlu0 %v1669_v16, %s1710_s4 }
 0xbc7   :  { %v713_v17 = vpop.permute.xlu0 %712 }
 0xbc8   :  { %v1935_v18 = vmul.f32 %v713_v17, %v695_v9 }
 0xbca   :  { %v717_v20 = vrot.slane %v1935_v18, 4 }
 0xbcc   :  { %718 = vrot.lane.b32.xlu1 %v717_v20, %s1711_s25 }
 0xc3e   :  { %v1939_v21 = vpop.permute.xlu1 %718 }
 0xc3f   :  { %1516 = vmatmul.mubr.msk.f32.vlgmr.msra.gmra.mrb[16].mxu0 %vm297_vm11, %v1939_v21 }
 0xc40   :  { %1604 = vmatpush3.bf16.msra.mxu0 %v1820_v19  ;;  %1537 = vmatprep.mubr.msk.f32.mxu0 %vm1707_vm0, %v1708_v3 }
 0xc41   :  { %1605 = vmatprep.subr.bf16.mxu0 %v1706_v0 }
 0xc44   :  { %1607 = vmatpush3.bf16.msra.mxu0 %v1830_v22 }
 0xd12   :  { %v788_v23 = vpop.f32.mrb[16].mxu0 }
 0xd13   :  { %v792_v24 = vadd.f32 %v788_v23, %v1869_v57  ;;  %v1517_v25 = vpop.f32.mrb[17].mxu0 }
 0xd15   :  { %v1351_v26 = vmul.f32 -1.442695, %v792_v24 }
 0xd17   :  { %1670 = vpow2.f32 %v1351_v26 }
 0xd18   :  { %1672 = vtanh.f32 %v792_v24 }
 0xd21   :  { %v1671_v27 = vpop.eup %1670 }
 0xd22   :  { %v797_v28 = vadd.f32 1.0, %v1671_v27  ;;  %v1673_v29 = vpop.eup %1672 }
 0xd24   :  { %1674 = vrcp.f32 %v797_v28 }
 0xd2e   :  { %v1675_v30 = vpop.eup %1674 }
 0xd2f   :  { %v800_v31 = vsel %vm1873_vm10, %v1673_v29, %v1675_v30 }
 0xd30   :  { %806 = vrot.lane.b32.xlu0 %v800_v31, %s1710_s4  ;;  %v804_v35 = vmul.f32 %v802_v34, %v800_v31 }
 0xda2   :  { %v807_v32 = vpop.permute.xlu0 %806 }
 0xda3   :  { %v809_v33 = vmul.f32 %v807_v32, %v800_v31 }
 0xda5   :  { %811 = vrot.lane.b32.xlu1 %v809_v33, %s1711_s25 }
 0xe17   :  { %v812_v37 = vpop.permute.xlu1 %811 }
 0xe18   :  { %v814_v39 = vadd.f32 %v812_v37, %v804_v35 }
 0xe1a   :  { %1676 = vtanh.f32 %v814_v39  ;;  %v909_v53 = vrot.slane %v814_v39, 4 }
 0xe24   :  { %v1677_v40 = vpop.eup %1676 }
 0xe25   :  { %817 = vrot.lane.b32.xlu0 %v1677_v40, %s1710_s4 }
 0xe97   :  { %v818_v41 = vpop.permute.xlu0 %817 }
 0xe98   :  { %v1954_v42 = vmul.f32 %v818_v41, %v800_v31 }
 0xe9a   :  { %822 = vrot.lane.b32.xlu1 %v1954_v42, %s1711_s25 }
 0xf0c   :  { %v823_v43 = vpop.permute.xlu1 %822 }
 0xf0d   :  { %1527 = vmatmul.mubr.msk.f32.vlgmr.msra.gmra.mrb[10].mxu1 %vm297_vm11, %v823_v43 }
 0xf0e   :  { %1610 = vmatpush3.bf16.msra.mxu1 %v1820_v19  ;;  %1548 = vmatprep.mubr.msk.f32.mxu1 %vm1707_vm0, %v1708_v3  ;;  %vm1225_vm0 = vcmask 23552  }
 0xf0f   :  { %1611 = vmatprep.subr.bf16.mxu1 %v1706_v0 }
 0xf12   :  { %1613 = vmatpush3.bf16.msra.mxu1 %v1830_v22 }
 0xfe0   :  { %v892_v44 = vpop.f32.mrb[10].mxu1 }
 0xfe1   :  { %v897_v45 = vrot.slane %v892_v44, 4  ;;  %v1528_v46 = vpop.f32.mrb[11].mxu1 }
 0xfe3   :  { %v899_v47 = vadd.f32 %v897_v45, %v1869_v57 }
 0xfe5   :  { %v1353_v48 = vmul.f32 -1.442695, %v899_v47 }
 0xfe7   :  { %1678 = vpow2.f32 %v1353_v48 }
 0xfe8   :  { %1680 = vtanh.f32 %v899_v47 }
 0xff1   :  { %v1679_v49 = vpop.eup %1678 }
 0xff2   :  { %v904_v50 = vadd.f32 1.0, %v1679_v49  ;;  %v1681_v51 = vpop.eup %1680 }
 0xff4   :  { %1682 = vrcp.f32 %v904_v50 }
 0xffe   :  { %v1683_v19 = vpop.eup %1682 }
 0xfff   :  { %v907_v3 = vsel %vm1873_vm10, %v1681_v51, %v1683_v19 }
0x1000   :  { %913 = vrot.lane.b32.xlu0 %v907_v3, %s1710_s4  ;;  %v911_v54 = vmul.f32 %v909_v53, %v907_v3 }
0x1072   :  { %v914_v0 = vpop.permute.xlu0 %913 }
0x1073   :  { %v916_v22 = vmul.f32 %v914_v0, %v907_v3 }
0x1075   :  { %918 = vrot.lane.b32.xlu1 %v916_v22, %s1711_s25 }
0x10e7   :  { %v919_v57 = vpop.permute.xlu1 %918 }
0x10e8   :  { %v921_v56 = vadd.f32 %v919_v57, %v911_v54 }
0x10ea   :  { %1684 = vtanh.f32 %v921_v56  ;;  %v1014_v52 = vrot.slane %v921_v56, 4 }
0x10f4   :  { %v1685_v58 = vpop.eup %1684 }
0x10f5   :  { %924 = vrot.lane.b32.xlu0 %v1685_v58, %s1710_s4 }
0x1167   :  { %v925_v60 = vpop.permute.xlu0 %924 }
0x1168   :  { %v1970_v61 = vmul.f32 %v925_v60, %v907_v3 }
0x116a   :  { %v929_v62 = vrot.slane %v1970_v61, 4 }
0x116c   :  { %930 = vrot.lane.b32.xlu1 %v929_v62, %s1711_s25 }
0x11de   :  { %v1974_v63 = vpop.permute.xlu1 %930 }
0x11df   :  { %1538 = vmatmul.mubr.msk.f32.vlgmr.msra.gmra.mrb[18].mxu0 %vm297_vm11, %v1974_v63 }
0x12b2   :  { %v1000_v1 = vpop.f32.mrb[18].mxu0 }
0x12b3   :  { %v1004_v4 = vadd.f32 %v1000_v1, %v1867_v55  ;;  %v1539_v5 = vpop.f32.mrb[19].mxu0 }
0x12b5   :  { %v1355_v6 = vmul.f32 -1.442695, %v1004_v4 }
0x12b7   :  { %1686 = vpow2.f32 %v1355_v6 }
0x12b8   :  { %1688 = vtanh.f32 %v1004_v4 }
0x12c1   :  { %v1687_v7 = vpop.eup %1686 }
0x12c2   :  { %v1009_v8 = vadd.f32 1.0, %v1687_v7  ;;  %v1689_v9 = vpop.eup %1688 }
0x12c4   :  { %1690 = vrcp.f32 %v1009_v8 }
0x12ce   :  { %v1691_v10 = vpop.eup %1690 }
0x12cf   :  { %v1012_v11 = vsel %vm1873_vm10, %v1689_v9, %v1691_v10 }
0x12d0   :  { %1018 = vrot.lane.b32.xlu0 %v1012_v11, %s1710_s4  ;;  %v1016_v15 = vmul.f32 %v1014_v52, %v1012_v11 }
0x1342   :  { %v1019_v12 = vpop.permute.xlu0 %1018 }
0x1343   :  { %v1021_v13 = vmul.f32 %v1019_v12, %v1012_v11 }
0x1345   :  { %1023 = vrot.lane.b32.xlu1 %v1021_v13, %s1711_s25 }
0x13b7   :  { %v1024_v16 = vpop.permute.xlu1 %1023 }
0x13b8   :  { %v1026_v17 = vadd.f32 %v1024_v16, %v1016_v15 }
0x13ba   :  { %1692 = vtanh.f32 %v1026_v17  ;;  %v1121_v40 = vrot.slane %v1026_v17, 4 }
0x13c4   :  { %v1693_v20 = vpop.eup %1692 }
0x13c5   :  { %1029 = vrot.lane.b32.xlu0 %v1693_v20, %s1710_s4 }
0x1437   :  { %v1030_v23 = vpop.permute.xlu0 %1029 }
0x1438   :  { %v1984_v24 = vmul.f32 %v1030_v23, %v1012_v11 }
0x143a   :  { %1034 = vrot.lane.b32.xlu1 %v1984_v24, %s1711_s25 }
0x14ac   :  { %v1035_v25 = vpop.permute.xlu1 %1034 }
0x14ad   :  { %1549 = vmatmul.mubr.msk.f32.vlgmr.msra.gmra.mrb[12].mxu1 %vm297_vm11, %v1035_v25 }
0x1580   :  { %v1104_v26 = vpop.f32.mrb[12].mxu1 }
0x1581   :  { %v1109_v27 = vrot.slane %v1104_v26, 4  ;;  %v1550_v28 = vpop.f32.mrb[13].mxu1 }
0x1583   :  { %v1111_v29 = vadd.f32 %v1109_v27, %v1867_v55 }
0x1585   :  { %v1357_v30 = vmul.f32 -1.442695, %v1111_v29 }
0x1587   :  { %1694 = vpow2.f32 %v1357_v30 }
0x1588   :  { %1696 = vtanh.f32 %v1111_v29 }
0x1591   :  { %v1695_v31 = vpop.eup %1694 }
0x1592   :  { %v1116_v32 = vadd.f32 1.0, %v1695_v31  ;;  %v1697_v33 = vpop.eup %1696 }
0x1594   :  { %1698 = vrcp.f32 %v1116_v32 }
0x159e   :  { %v1699_v34 = vpop.eup %1698 }
0x159f   :  { %v1119_v35 = vsel %vm1873_vm10, %v1697_v33, %v1699_v34 }
0x15a0   :  { %1125 = vrot.lane.b32.xlu0 %v1119_v35, %s1710_s4  ;;  %v1123_v41 = vmul.f32 %v1121_v40, %v1119_v35  ;;  %v1712_v40 = vmov 1  }
0x15a1   :  { %1630 = vset.pattern.permute.xlu1 %v1712_v40 }
0x1612   :  { %v1126_v37 = vpop.permute.xlu0 %1125 }
0x1613   :  { %v1128_v39 = vmul.f32 %v1126_v37, %v1119_v35 }
0x1615   :  { %1130 = vrot.lane.b32.xlu1 %v1128_v39, %s1711_s25 }
0x1687   :  { %v1131_v55 = vpop.permute.xlu1 %1130 }
0x1688   :  { %v1133_v43 = vadd.f32 %v1131_v55, %v1123_v41 }
0x168a   :  { %1700 = vtanh.f32 %v1133_v43 }
0x1694   :  { %v1701_v44 = vpop.eup %1700 }
0x1695   :  { %1136 = vrot.lane.b32.xlu0 %v1701_v44, %s1710_s4  ;;  %v1713_v44 = vmov 3  }
0x1707   :  { %v1137_v45 = vpop.permute.xlu0 %1136 }
0x1708   :  { %v1139_v46 = vmul.f32 %v1137_v45, %v1119_v35  ;;  %v1714_v45 = vmov 2  }
0x170a   :  { %v1995_v47 = vrot.slane %v1139_v46, 4  ;;  %v1152_v2 = vmul.f32 %v1139_v46, %v1898_v36  ;;  %v1169_v49 = vmul.f32 %v1139_v46, %v1935_v18  ;;  %v1185_v51 = vmul.f32 %v1139_v46, %v1970_v61 }
0x170b   :  { %v1201_v19 = vmul.f32 %v1139_v46, %v1139_v46  ;;  %v1715_v46 = vmov 5  }
0x170c   :  { %1154 = vrot.lane.b32.xlu1 %v1152_v2, %s1711_s25  ;;  %v1143_v48 = vmul.f32 %v1995_v47, %v1882_v14  ;;  %v1161_v50 = vmul.f32 %v1995_v47, %v1918_v59  ;;  %v1177_v36 = vmul.f32 %v1995_v47, %v1954_v42  ;;  %v1193_v18 = vmul.f32 %v1995_v47, %v1984_v24 }
0x170d   :  { %v1716_v2 = vmov 7  }
0x170e   :  { %1145 = vrot.lane.b32.xlu0 %v1143_v48, %s1711_s25  ;;  %v1717_v48 = vmov 4  }
0x1710   :  { %1171 = vrot.lane.b32.xlu1 %v1169_v49, %s1711_s25  ;;  %v1718_v49 = vmov 6  }
0x1712   :  { %1163 = vrot.lane.b32.xlu0 %v1161_v50, %s1711_s25 }
0x1714   :  { %1187 = vrot.lane.b32.xlu1 %v1185_v51, %s1711_s25 }
0x1716   :  { %1179 = vrot.lane.b32.xlu0 %v1177_v36, %s1711_s25 }
0x1718   :  { %1203 = vrot.lane.b32.xlu1 %v1201_v19, %s1711_s25 }
0x171a   :  { %1195 = vrot.lane.b32.xlu0 %v1193_v18, %s1711_s25 }
0x177e   :  { %v1155_v3 = vpop.permute.xlu1 %1154 }
0x177f   :  { %v1158_v0 = vsel %vm1157_vm12, %v1155_v3, 0.0 }
0x1780   :  { %1159 = vadd.xlane.f32.xlu1 %v1158_v0  ;;  %v1146_v22 = vpop.permute.xlu0 %1145 }
0x1781   :  { %v1149_v1 = vsel %vm1148_vm13, %v1146_v22, 0.0 }
0x1782   :  { %v1172_v53 = vpop.permute.xlu1 %1171 }
0x1783   :  { %v1174_v54 = vsel %vm1157_vm12, %v1172_v53, 0.0 }
0x1784   :  { %1175 = vadd.xlane.f32.xlu0 %v1174_v54  ;;  %v1164_v57 = vpop.permute.xlu0 %1163 }
0x1785   :  { %v1166_v56 = vsel %vm1148_vm13, %v1164_v57, 0.0 }
0x1786   :  { %v1188_v58 = vpop.permute.xlu1 %1187  ;;  %1167 = vadd.xlane.f32.xlu1 %v1166_v56 }
0x1787   :  { %v1190_v60 = vsel %vm1157_vm12, %v1188_v58, 0.0 }
0x1788   :  { %1191 = vadd.xlane.f32.xlu0 %v1190_v60  ;;  %v1180_v61 = vpop.permute.xlu0 %1179 }
0x1789   :  { %v1182_v62 = vsel %vm1148_vm13, %v1180_v61, 0.0 }
0x178a   :  { %1183 = vadd.xlane.f32.xlu1 %v1182_v62  ;;  %v1204_v4 = vpop.permute.xlu1 %1203 }
0x178b   :  { %v1206_v7 = vsel %vm1157_vm12, %v1204_v4, 0.0 }
0x178c   :  { %1150 = vadd.xlane.f32.xlu0 %v1149_v1  ;;  %v1196_v5 = vpop.permute.xlu0 %1195 }
0x178d   :  { %v1198_v6 = vsel %vm1148_vm13, %v1196_v5, 0.0 }
0x178e   :  { %1199 = vadd.xlane.f32.xlu1 %v1198_v6 }
0x1790   :  { %1207 = vadd.xlane.f32.xlu0 %v1206_v7 }
0x180d   :  { %v1160_v8 = vpop.xlane.xlu1 %1159 }
0x180e   :  { %v1210_v12 = vrot.slane %v1160_v8, 4 }
0x1811   :  { %v1176_v9 = vpop.xlane.xlu0 %1175 }
0x1812   :  { %v1213_v15 = vrot.slane %v1176_v9, 4 }
0x1813   :  { %v1168_v10 = vpop.xlane.xlu1 %1167 }
0x1815   :  { %v1192_v11 = vpop.xlane.xlu0 %1191 }
0x1816   :  { %v1216_v20 = vrot.slane %v1192_v11, 4 }
0x1817   :  { %v1184_v13 = vpop.xlane.xlu1 %1183 }
0x1819   :  { %v1151_v52 = vpop.xlane.xlu0 %1150 }
0x181a   :  { %v1222_v16 = vsel %vm1221_vm14, %v1151_v52, %v1210_v12 }
0x181b   :  { %v1224_v17 = vsel %vm1223_vm15, %v1222_v16, %v1168_v10  ;;  %v1200_v27 = vpop.xlane.xlu1 %1199 }
0x181c   :  { %v1226_v23 = vsel %vm1225_vm0, %v1224_v17, %v1213_v15 }
0x181d   :  { %v1228_v25 = vsel %vm1227_vm1, %v1226_v23, %v1184_v13  ;;  %v1208_v26 = vpop.xlane.xlu0 %1207 }
0x181e   :  { %v1230_v28 = vsel %vm1229_vm2, %v1228_v25, %v1216_v20  ;;  %v1219_v29 = vrot.slane %v1208_v26, 4 }
0x181f   :  { %v1232_v30 = vsel %vm1231_vm3, %v1230_v28, %v1200_v27 }
0x1820   :  { %v1234_v31 = vsel %vm1233_vm4, %v1232_v30, %v1219_v29 }
0x1821   :  { %v1236_v32 = vsel %vm1235_vm5, %v1234_v31, -inf }
0x1822   :  { %1237 = vmax.xlane.f32.xlu0 %v1236_v32 }
0x18af   :  { %v1238_v33 = vpop.xlane.xlu0 %1237 }
0x18b0   :  { %v1239_v34 = vsub.f32 %v1234_v31, %v1238_v33 }
0x18b2   :  { %v1240_v35 = vmul.f32 1.442695, %v1239_v34 }
0x18b4   :  { %1702 = vpow2.f32 %v1240_v35 }
0x18be   :  { %v1703_v37 = vpop.eup %1702 }
0x18bf   :  { %v1242_v39 = vsel %vm1235_vm5, %v1703_v37, 0.0 }
0x18c0   :  { %1243 = vadd.xlane.f32.xlu1 %v1242_v39 }
0x194d   :  { %v1244_v41 = vpop.xlane.xlu1 %1243 }
0x194e   :  { %1704 = vrcp.f32 %v1244_v41 }
0x1958   :  { %v1705_v55 = vpop.eup %1704 }
0x1959   :  { %v1246_v43 = vmul.f32 %v1705_v55, %v1703_v37 }
0x195b   :  { %1254 = vperm.xlu1 %1630, %v1246_v43   ;;  %1249 = vperm.xlu0 %1628, %v1246_v43  }
0x195f   :  { %1632 = vset.pattern.permute.xlu1 %v1713_v44  ;;  %1631 = vset.pattern.permute.xlu0 %v1714_v45 }
0x1960   :  { %1271 = vperm.xlu1 %1632, %v1246_v43   ;;  %1265 = vperm.xlu0 %1631, %v1246_v43  }
0x1964   :  { %1633 = vset.pattern.permute.xlu1 %v1715_v46  ;;  %1634 = vset.pattern.permute.xlu0 %v1716_v2 }
0x1965   :  { %1288 = vperm.xlu1 %1633, %v1246_v43   ;;  %1305 = vperm.xlu0 %1634, %v1246_v43  }
0x1969   :  { %1308 = vrot.lane.b32.xlu1 %v1995_v47, %s1711_s25  ;;  %1635 = vset.pattern.permute.xlu0 %v1717_v48 }
0x196a   :  { %1282 = vperm.xlu0 %1635, %v1246_v43   ;;  %1636 = vset.pattern.permute.xlu1 %v1718_v49 }
0x196e   :  { %1637 = vset.pattern.permute.xlu0 %v1716_v2 }
0x19da   :  { %v1255_v50 = vpop.permute.xlu1 %1254  ;;  %v1250_v36 = vpop.permute.xlu0 %1249 }
0x19db   :  { %v1258_v51 = vmul.f32 %v1255_v50, %v1902_v38  ;;  %v1252_v57 = vmul.f32 %v1250_v36, %v1882_v14 }
0x19dd   :  { %1260 = vrot.lane.b32.xlu1 %v1258_v51, %s1719_s2 }
0x19df   :  { %v1272_v19 = vpop.permute.xlu1 %1271  ;;  %v1266_v3 = vpop.permute.xlu0 %1265 }
0x19e0   :  { %v1275_v18 = vmul.f32 %v1272_v19, %v1939_v21  ;;  %v1268_v56 = vmul.f32 %v1266_v3, %v1918_v59 }
0x19e2   :  { %1277 = vrot.lane.b32.xlu1 %v1275_v18, %s1719_s2 }
0x19e4   :  { %v1289_v0 = vpop.permute.xlu1 %1288  ;;  %v1306_v22 = vpop.permute.xlu0 %1305 }
0x19e5   :  { %v1292_v47 = vmul.f32 %v1289_v0, %v1974_v63 }
0x19e7   :  { %1294 = vrot.lane.b32.xlu1 %v1292_v47, %s1719_s2 }
0x19e8   :  { %v1309_v53 = vpop.permute.xlu1 %1308 }
0x19e9   :  { %v1311_v54 = vmul.f32 %v1309_v53, %v1306_v22  ;;  %v1283_v21 = vpop.permute.xlu0 %1282 }
0x19ea   :  { %v1285_v1 = vmul.f32 %v1283_v21, %v1954_v42 }
0x19eb   :  { %1299 = vperm.xlu1 %1636, %v1246_v43   ;;  %1313 = vrot.lane.b32.xlu0 %v1311_v54, %s1719_s2 }
0x1a4f   :  { %v1261_v38 = vpop.permute.xlu1 %1260 }
0x1a50   :  { %v1263_v58 = vadd.f32 %v1261_v38, %v1252_v57 }
0x1a52   :  { %v1269_v60 = vadd.f32 %v1268_v56, %v1263_v58 }
0x1a54   :  { %v1278_v61 = vpop.permute.xlu1 %1277 }
0x1a55   :  { %v1280_v62 = vadd.f32 %v1278_v61, %v1269_v60 }
0x1a57   :  { %v1286_v63 = vadd.f32 %v1285_v1, %v1280_v62 }
0x1a59   :  { %v1295_v4 = vpop.permute.xlu1 %1294 }
0x1a5a   :  { %v1297_v6 = vadd.f32 %v1295_v4, %v1286_v63 }
0x1a5d   :  { %v1314_v9 = vpop.permute.xlu0 %1313 }
0x1a6a   :  { %v1300_v5 = vpop.permute.xlu1 %1299 }
0x1a6b   :  { %v1302_v7 = vmul.f32 %v1300_v5, %v1984_v24 }
0x1a6d   :  { %v1303_v8 = vadd.f32 %v1302_v7, %v1297_v6 }
0x1a6f   :  { %v1316_v10 = vadd.f32 %v1314_v9, %v1303_v8 }
0x1a71   :  { %1318 = vrot.lane.b32.xlu1 %v1316_v10, %s1711_s25 }
0x1ae3   :  { %v1319_v14 = vpop.permute.xlu1 %1318 }
0x1ae4   :  { %1321 = vst.msk [vmem:[%s2043_s5] sm:$0xf] %vm1148_vm13, %v1319_v14 }

</bundles_post_ra>
